<compile_context>
chip_gen: v7x
topology: tpu7x:2x2x1
jax: 0.10.0
libtpu: 0.0.40
codegen_flags: <defaults>
</compile_context>

<pallas_src>
import functools

import jax
import jax.numpy as jnp
from jax.experimental import pallas as pl
from jax.experimental.pallas import tpu as pltpu


LN_EPS = 1e-5  # nn.LayerNorm default


def _round_up(x, m):
    return (x + m - 1) // m * m


def _vmem_capacity_bytes():
    """Per-TensorCore VMEM capacity; conservative fallback if query fails."""
    try:
        return int(pltpu.get_tpu_info().vmem_capacity_bytes)
    except Exception:
        return 64 * 1024 * 1024  # v7x per-TC VMEM (smallest current generation)


def _const_spec(shape, index_map, single_buffer):
    """BlockSpec for an operand whose block index never changes.

    Single-buffering (pl.Buffered(1)) avoids a useless second VMEM copy of the
    resident weight/bias.  Falls back to the default spec if this jax build
    lacks pipeline_mode.
    """
    if single_buffer and hasattr(pl, "Buffered"):
        try:
            return pl.BlockSpec(shape, index_map, pipeline_mode=pl.Buffered(1))
        except TypeError:
            pass
    return pl.BlockSpec(shape, index_map)


def _prenorm_kernel(x_ref, w_ref, b_ref, o_ref, *scratch,
                    d_actual, mm_dtype, cache_normed):
    """Fused LayerNorm(last dim) + Linear for one (row-tile, col-tile) block.

    x_ref: (TM, Dp) input rows, feature axis zero-padded to Dp
    w_ref: (Dp, TN) gamma-folded Linear weight slab (already transposed), bf16
    b_ref: (1, TN)  beta-folded Linear bias slab, f32
    o_ref: (TM, TN) output block
    scratch (only when H is column-tiled): (TM, Dp) bf16 normed-tile cache
    """

    def _layernorm():
        x = x_ref[...].astype(jnp.float32)
        inv_d = 1.0 / float(d_actual)
        # Padded feature lanes are zero, so sums over Dp equal sums over D.
        mean = jnp.sum(x, axis=-1, keepdims=True) * inv_d
        var = jnp.sum(x * x, axis=-1, keepdims=True) * inv_d - mean * mean
        var = jnp.maximum(var, 0.0)  # guard tiny negative cancellation error
        inv_std = jax.lax.rsqrt(var + LN_EPS)
        # gamma/beta are folded into w_ref/b_ref on the wrapper side; padded
        # lanes of (x - mean) hit zero-padded W rows, so they stay inert.
        return ((x - mean) * inv_std).astype(mm_dtype)

    if cache_normed:
        normed_ref = scratch[0]

        @pl.when(pl.program_id(1) == 0)
        def _():
            normed_ref[...] = _layernorm()

        normed = normed_ref[...]
    else:
        normed = _layernorm()

    y = jnp.dot(normed, w_ref[...], preferred_element_type=jnp.float32)
    o_ref[...] = (y + b_ref[...]).astype(o_ref.dtype)


def prenorm_linear(x, gamma, beta, w, b, *, row_tile=None, col_tile=None,
                   matmul_dtype=jnp.bfloat16, single_buffer_consts=True):
    """PreNorm(dim, fn=Linear(dim, dim)) forward.

    x:     (B, N, D) float32
    gamma: (D,), beta: (D,)   LayerNorm affine params
    w:     (H, D)             Linear weight, PyTorch (out_features, in_features)
    b:     (H,)               Linear bias
    returns (B, N, H)
    """
    B, N, D = x.shape
    H = w.shape[0]
    rows = B * N
    itemsize = jnp.dtype(matmul_dtype).itemsize

    # ---- generation-aware VMEM budget ---------------------------------------
    vmem_cap = _vmem_capacity_bytes()               # 64 MiB v7x, 128 MiB v5e/v6e
    vmem_limit = min(vmem_cap * 3 // 4, 100 * 1024 * 1024)
    if row_tile is None:
        # Fatter row tiles on the big-VMEM / low-HBM-BW generations (v5e/v6e).
        row_tile = 512 if vmem_cap >= 100 * 1024 * 1024 else 256

    # ---- lane-dense / MXU-friendly padded sizes -----------------------------
    Dp = _round_up(D, 128)                          # reduction axis: lane-dense
    Hp = _round_up(H, 128)                          # output axis: unmasked vst
    tm = min(row_tile, _round_up(rows, 8))          # row tile, 8-sublane aligned

    full_w_bytes = Dp * Hp * itemsize
    if col_tile is not None:
        tn = min(Hp, _round_up(col_tile, 128))
    elif full_w_bytes <= vmem_limit // 3:
        tn = Hp                                     # whole W^T resident, DMA'd once
    else:
        # Column-tiled: W^T slab is double-buffered, so size ONE buffer to at
        # most vmem_limit/4 (two buffers <= half the budget, rest for x/out).
        tn = min(Hp, max(128, (vmem_limit // 4 // (Dp * itemsize)) // 128 * 128))
    Hp = _round_up(Hp, tn)
    n_col_tiles = Hp // tn

    rows_p = _round_up(rows, tm)
    n_row_tiles = rows_p // tm
    # Keep both v7x TensorCores busy: never collapse to a single grid program.
    if n_row_tiles * n_col_tiles == 1 and rows > 8:
        tm = _round_up((rows + 1) // 2, 8)
        rows_p = _round_up(rows, tm)
        n_row_tiles = rows_p // tm

    cache_normed = n_col_tiles > 1

    # ---- wrapper-side layout plumbing (zero-padding + one-time fold) --------
    x2 = jnp.pad(x.reshape(rows, D), ((0, rows_p - rows), (0, Dp - D)))
    gamma32 = gamma.astype(jnp.float32)
    beta32 = beta.astype(jnp.float32)
    w32t = w.astype(jnp.float32).T                                  # (D, H)
    wT = jnp.pad(gamma32[:, None] * w32t,
                 ((0, Dp - D), (0, Hp - H))).astype(matmul_dtype)   # (Dp, Hp)
    b_fold = beta32 @ w32t + b.astype(jnp.float32)                  # (H,)
    b2 = jnp.pad(b_fold, (0, Hp - H)).reshape(1, Hp)

    kernel = functools.partial(_prenorm_kernel, d_actual=D,
                               mm_dtype=matmul_dtype, cache_normed=cache_normed)

    # W / bias blocks only vary along the H grid axis -> single-buffer them
    # whenever that axis is trivial; otherwise default double-buffering hides
    # the slab DMA behind the matmul (budgeted above).
    w_single = single_buffer_consts and n_col_tiles == 1

    scratch_shapes = ([pltpu.VMEM((tm, Dp), matmul_dtype)]
                      if cache_normed else [])

    out = pl.pallas_call(
        kernel,
        out_shape=jax.ShapeDtypeStruct((rows_p, Hp), x.dtype),
        grid_spec=pltpu.PrefetchScalarGridSpec(
            num_scalar_prefetch=0,
            grid=(n_row_tiles, n_col_tiles),
            in_specs=[
                pl.BlockSpec((tm, Dp), lambda i, j: (i, 0)),            # x tile
                _const_spec((Dp, tn), lambda i, j: (0, j), w_single),   # W^T slab
                _const_spec((1, tn), lambda i, j: (0, j), w_single),    # bias slab
            ],
            out_specs=pl.BlockSpec((tm, tn), lambda i, j: (i, j)),
            scratch_shapes=scratch_shapes,
        ),
        compiler_params=pltpu.CompilerParams(
            # j axis carries the cached normed tile when H is column-tiled.
            dimension_semantics=("parallel",
                                 "arbitrary" if cache_normed else "parallel"),
            vmem_limit_bytes=vmem_limit,
        ),
    )(x2, wT, b2)

    return out[:rows, :H].reshape(B, N, H)


def _reference(x, gamma, beta, w, b):
    mean = jnp.mean(x, axis=-1, keepdims=True)
    var = jnp.mean((x - mean) ** 2, axis=-1, keepdims=True)
    normed = (x - mean) * jax.lax.rsqrt(var + LN_EPS) * gamma + beta
    return normed @ w.T + b


if __name__ == "__main__":
    key = jax.random.PRNGKey(0)
    B, N, D = 2, 8, 32  # batch, seq, hidden (dim for LayerNorm)

    k_x, k_g, k_b, k_w, k_bb = jax.random.split(key, 5)
    x = jax.random.normal(k_x, (B, N, D), dtype=jnp.float32)

    # Deterministic parameter init (synthetic, not a checkpoint).
    # TODO(synk): PreNorm wraps an arbitrary `fn`; it is instantiated here as
    # the canonical Linear(dim, dim) so the whole forward fuses into one kernel.
    gamma = 1.0 + 0.01 * jax.random.normal(k_g, (D,), dtype=jnp.float32)
    beta = 0.01 * jax.random.normal(k_b, (D,), dtype=jnp.float32)
    w = 0.05 * jax.random.normal(k_w, (D, D), dtype=jnp.float32)  # (out, in)
    bias = 0.01 * jax.random.normal(k_bb, (D,), dtype=jnp.float32)

    ref = _reference(x, gamma, beta, w, bias)

    def _run(single_buffer):
        out = prenorm_linear(x, gamma, beta, w, bias,
                             single_buffer_consts=single_buffer)
        out = jax.block_until_ready(out)
        assert out.shape == (B, N, D)
        # bf16 MXU operands (gamma folded into W) with f32 accumulation ->
        # loose-ish tolerance vs. the pure-f32 reference.
        assert jnp.allclose(out, ref, atol=3e-2, rtol=3e-2), "mismatch vs reference"
        return out

    try:
        _run(True)
    except Exception:
        # Fall back to default double-buffering if this jax/libtpu build
        # rejects pl.Buffered(1) on constant-index operands.
        _run(False)

    print("KERNEL_OK")
</pallas_src>

<mosaic_0001>
module attributes {stable_mosaic.version = 11 : i64} {
  func.func @_prenorm_kernel(%arg0: i32, %arg1: i32, %arg2: memref<8x128xf32, #tpu.memory_space<vmem>>, %arg3: memref<128x128xbf16, #tpu.memory_space<vmem>>, %arg4: memref<1x128xf32, #tpu.memory_space<vmem>>, %arg5: memref<8x128xf32, #tpu.memory_space<vmem>>) attributes {dimension_semantics = [#tpu.dimension_semantics<parallel>, #tpu.dimension_semantics<parallel>], iteration_bounds = array<i64: 2, 1>, scalar_prefetch = 0 : i64, scratch_operands = 0 : i64, tpu.core_type = #tpu.core_type<tc>, window_params = [{transform_indices = @transform_0, window_bounds = array<i64: 8, 128>}, {pipeline_mode = #tpu.pipeline_mode<synchronous>, transform_indices = @transform_1, window_bounds = array<i64: 128, 128>}, {pipeline_mode = #tpu.pipeline_mode<synchronous>, transform_indices = @transform_2, window_bounds = array<i64: 1, 128>}, {transform_indices = @transform_3, window_bounds = array<i64: 8, 128>}]} {
    %c0 = arith.constant 0 : index
    %c0_0 = arith.constant 0 : index
    %0 = vector.load %arg2[%c0, %c0_0] : memref<8x128xf32, #tpu.memory_space<vmem>>, vector<8x128xf32>
    %cst = arith.constant dense<0.000000e+00> : vector<8xf32>
    %1 = vector.multi_reduction <add>, %0, %cst [1] : vector<8x128xf32> to vector<8xf32>
    %2 = vector.shape_cast %1 : vector<8xf32> to vector<8x1xf32>
    %cst_1 = arith.constant 3.125000e-02 : f32
    %3 = vector.broadcast %cst_1 : f32 to vector<8x1xf32>
    %4 = arith.mulf %2, %3 : vector<8x1xf32>
    %5 = arith.mulf %0, %0 : vector<8x128xf32>
    %cst_2 = arith.constant dense<0.000000e+00> : vector<8xf32>
    %6 = vector.multi_reduction <add>, %5, %cst_2 [1] : vector<8x128xf32> to vector<8xf32>
    %7 = vector.shape_cast %6 : vector<8xf32> to vector<8x1xf32>
    %cst_3 = arith.constant 3.125000e-02 : f32
    %8 = vector.broadcast %cst_3 : f32 to vector<8x1xf32>
    %9 = arith.mulf %7, %8 : vector<8x1xf32>
    %10 = arith.mulf %4, %4 : vector<8x1xf32>
    %11 = arith.subf %9, %10 : vector<8x1xf32>
    %cst_4 = arith.constant 0.000000e+00 : f32
    %12 = vector.broadcast %cst_4 : f32 to vector<8x1xf32>
    %13 = arith.maximumf %11, %12 : vector<8x1xf32>
    %cst_5 = arith.constant 9.99999974E-6 : f32
    %14 = vector.broadcast %cst_5 : f32 to vector<8x1xf32>
    %15 = arith.addf %13, %14 : vector<8x1xf32>
    %16 = math.rsqrt %15 : vector<8x1xf32>
    %17 = vector.broadcast %4 : vector<8x1xf32> to vector<8x128xf32>
    %18 = arith.subf %0, %17 : vector<8x128xf32>
    %19 = vector.broadcast %16 : vector<8x1xf32> to vector<8x128xf32>
    %20 = arith.mulf %18, %19 : vector<8x128xf32>
    %21 = arith.truncf %20 : vector<8x128xf32> to vector<8x128xbf16>
    %c0_6 = arith.constant 0 : index
    %c0_7 = arith.constant 0 : index
    %22 = vector.load %arg3[%c0_6, %c0_7] : memref<128x128xbf16, #tpu.memory_space<vmem>>, vector<128x128xbf16>
    %cst_8 = arith.constant dense<0.000000e+00> : vector<8x128xf32>
    %23 = tpu.matmul %21, %22, %cst_8 {dimension_numbers = #tpu.dot_dimension_numbers<[1], [0], [0], [1], [0, 0, 1, 1], [], []>} : vector<8x128xbf16>, vector<128x128xbf16>, vector<8x128xf32> -> vector<8x128xf32>
    %c0_9 = arith.constant 0 : index
    %c0_10 = arith.constant 0 : index
    %24 = vector.load %arg4[%c0_9, %c0_10] : memref<1x128xf32, #tpu.memory_space<vmem>>, vector<1x128xf32>
    %25 = vector.broadcast %24 : vector<1x128xf32> to vector<8x128xf32>
    %26 = arith.addf %23, %25 : vector<8x128xf32>
    %c0_11 = arith.constant 0 : index
    %c0_12 = arith.constant 0 : index
    %27 = vector.load %arg5[%c0_11, %c0_12] : memref<8x128xf32, #tpu.memory_space<vmem>>, vector<8x128xf32>
    tpu.vector_store %arg5[%c0_11, %c0_12], %26 {strides = array<i32>} : memref<8x128xf32, #tpu.memory_space<vmem>>, vector<8x128xf32>,
    return
  }
  func.func @transform_0(%arg0: i32, %arg1: i32) -> (i32, i32) {
    %c0_i32 = arith.constant 0 : i32
    %c0_i32_0 = arith.constant 0 : i32
    return %arg0, %c0_i32 : i32, i32
  }
  func.func @transform_1(%arg0: i32, %arg1: i32) -> (i32, i32) {
    %c0_i32 = arith.constant 0 : i32
    %c0_i32_0 = arith.constant 0 : i32
    return %c0_i32, %arg1 : i32, i32
  }
  func.func @transform_2(%arg0: i32, %arg1: i32) -> (i32, i32) {
    %c0_i32 = arith.constant 0 : i32
    %c0_i32_0 = arith.constant 0 : i32
    return %c0_i32, %arg1 : i32, i32
  }
  func.func @transform_3(%arg0: i32, %arg1: i32) -> (i32, i32) {
    %c0_i32 = arith.constant 0 : i32
    return %arg0, %arg1 : i32, i32
  }
}

module attributes {stable_mosaic.version = 11 : i64} {
  func.func @_prenorm_kernel(%arg0: i32, %arg1: i32, %arg2: memref<8x128xf32, #tpu.memory_space<vmem>>, %arg3: memref<128x128xbf16, #tpu.memory_space<vmem>>, %arg4: memref<1x128xf32, #tpu.memory_space<vmem>>, %arg5: memref<8x128xf32, #tpu.memory_space<vmem>>) attributes {dimension_semantics = [#tpu.dimension_semantics<parallel>, #tpu.dimension_semantics<parallel>], iteration_bounds = array<i64: 2, 1>, scalar_prefetch = 0 : i64, scratch_operands = 0 : i64, tpu.core_type = #tpu.core_type<tc>, window_params = [{transform_indices = @transform_0, window_bounds = array<i64: 8, 128>}, {transform_indices = @transform_1, window_bounds = array<i64: 128, 128>}, {transform_indices = @transform_2, window_bounds = array<i64: 1, 128>}, {transform_indices = @transform_3, window_bounds = array<i64: 8, 128>}]} {
    %c0 = arith.constant 0 : index
    %c0_0 = arith.constant 0 : index
    %0 = vector.load %arg2[%c0, %c0_0] : memref<8x128xf32, #tpu.memory_space<vmem>>, vector<8x128xf32>
    %cst = arith.constant dense<0.000000e+00> : vector<8xf32>
    %1 = vector.multi_reduction <add>, %0, %cst [1] : vector<8x128xf32> to vector<8xf32>
    %2 = vector.shape_cast %1 : vector<8xf32> to vector<8x1xf32>
    %cst_1 = arith.constant 3.125000e-02 : f32
    %3 = vector.broadcast %cst_1 : f32 to vector<8x1xf32>
    %4 = arith.mulf %2, %3 : vector<8x1xf32>
    %5 = arith.mulf %0, %0 : vector<8x128xf32>
    %cst_2 = arith.constant dense<0.000000e+00> : vector<8xf32>
    %6 = vector.multi_reduction <add>, %5, %cst_2 [1] : vector<8x128xf32> to vector<8xf32>
    %7 = vector.shape_cast %6 : vector<8xf32> to vector<8x1xf32>
    %cst_3 = arith.constant 3.125000e-02 : f32
    %8 = vector.broadcast %cst_3 : f32 to vector<8x1xf32>
    %9 = arith.mulf %7, %8 : vector<8x1xf32>
    %10 = arith.mulf %4, %4 : vector<8x1xf32>
    %11 = arith.subf %9, %10 : vector<8x1xf32>
    %cst_4 = arith.constant 0.000000e+00 : f32
    %12 = vector.broadcast %cst_4 : f32 to vector<8x1xf32>
    %13 = arith.maximumf %11, %12 : vector<8x1xf32>
    %cst_5 = arith.constant 9.99999974E-6 : f32
    %14 = vector.broadcast %cst_5 : f32 to vector<8x1xf32>
    %15 = arith.addf %13, %14 : vector<8x1xf32>
    %16 = math.rsqrt %15 : vector<8x1xf32>
    %17 = vector.broadcast %4 : vector<8x1xf32> to vector<8x128xf32>
    %18 = arith.subf %0, %17 : vector<8x128xf32>
    %19 = vector.broadcast %16 : vector<8x1xf32> to vector<8x128xf32>
    %20 = arith.mulf %18, %19 : vector<8x128xf32>
    %21 = arith.truncf %20 : vector<8x128xf32> to vector<8x128xbf16>
    %c0_6 = arith.constant 0 : index
    %c0_7 = arith.constant 0 : index
    %22 = vector.load %arg3[%c0_6, %c0_7] : memref<128x128xbf16, #tpu.memory_space<vmem>>, vector<128x128xbf16>
    %cst_8 = arith.constant dense<0.000000e+00> : vector<8x128xf32>
    %23 = tpu.matmul %21, %22, %cst_8 {dimension_numbers = #tpu.dot_dimension_numbers<[1], [0], [0], [1], [0, 0, 1, 1], [], []>} : vector<8x128xbf16>, vector<128x128xbf16>, vector<8x128xf32> -> vector<8x128xf32>
    %c0_9 = arith.constant 0 : index
    %c0_10 = arith.constant 0 : index
    %24 = vector.load %arg4[%c0_9, %c0_10] : memref<1x128xf32, #tpu.memory_space<vmem>>, vector<1x128xf32>
    %25 = vector.broadcast %24 : vector<1x128xf32> to vector<8x128xf32>
    %26 = arith.addf %23, %25 : vector<8x128xf32>
    %c0_11 = arith.constant 0 : index
    %c0_12 = arith.constant 0 : index
    %27 = vector.load %arg5[%c0_11, %c0_12] : memref<8x128xf32, #tpu.memory_space<vmem>>, vector<8x128xf32>
    tpu.vector_store %arg5[%c0_11, %c0_12], %26 {strides = array<i32>} : memref<8x128xf32, #tpu.memory_space<vmem>>, vector<8x128xf32>,
    return
  }
  func.func @transform_0(%arg0: i32, %arg1: i32) -> (i32, i32) {
    %c0_i32 = arith.constant 0 : i32
    %c0_i32_0 = arith.constant 0 : i32
    return %arg0, %c0_i32 : i32, i32
  }
  func.func @transform_1(%arg0: i32, %arg1: i32) -> (i32, i32) {
    %c0_i32 = arith.constant 0 : i32
    %c0_i32_0 = arith.constant 0 : i32
    return %c0_i32, %arg1 : i32, i32
  }
  func.func @transform_2(%arg0: i32, %arg1: i32) -> (i32, i32) {
    %c0_i32 = arith.constant 0 : i32
    %c0_i32_0 = arith.constant 0 : i32
    return %c0_i32, %arg1 : i32, i32
  }
  func.func @transform_3(%arg0: i32, %arg1: i32) -> (i32, i32) {
    %c0_i32 = arith.constant 0 : i32
    return %arg0, %arg1 : i32, i32
  }
}

</mosaic_0001>

<bundles_post_ra>
// kernel: tpu_custom_call.1
= control target key start
LH: loop header
LB: loop body
LE: loop exit
PB: predicated region body
PF: predicated region fallthrough
CT: control target
= control target key end

     0   :  { %8 = vsyncpa [#allocation3], 0  ;;  %s1018_s0 = inlined_call_operand.hbm [shape: f32[16,128], index: 0, kind: input, shape index: {}]   ;;  %s1019_s1 = inlined_call_operand.hbm [shape: bf16[128,128], index: 1, kind: input, shape index: {}]   ;;  %s1020_s2 = inlined_call_operand.vmem [shape: f32[1,128], index: 2, kind: input, shape index: {}]   ;;  %s1021_s3 = inlined_call_operand.hbm [shape: f32[16,128], index: 3, kind: output, shape index: {}]  }
   0x1   :  { %10 = vsyncpa [#allocation3 + $0x1], 0 }
   0x2   :  { %11 = vsyncpa [#allocation6], 0 }
   0x3   :  { %12 = vsyncpa [#allocation4], 0 }
   0x4   :  { %14 = vsyncpa [#allocation4 + $0x1], 0  ;;  %s797_s12 = smov 0   ;;  %s799_s13 = smov 0  }
   0x5   :  { %s801_s14 = smov 0   ;;  %s803_s15 = smov 0  }
   0x6   :  { %s805_s16 = smov 0   ;;  %s807_s17 = smov 0  }
   0x7 LB: > { %s483_s18 = sadd.s32 4294967295, %s768_s17   ;;  %s484_s19 = sadd.s32 4294967294, %s768_s17   ;;  %s768_s17 = sphi %s807_s17, %s20_s17   ;;  %s764_s16 = sphi %s805_s16, %s1045_s16   ;;  %s760_s15 = sphi %s803_s15, %s1044_s15   ;;  %s756_s14 = sphi %s801_s14, %s1043_s14   ;;  %s752_s13 = sphi %s799_s13, %s1042_s13   ;;  %s748_s12 = sphi %s797_s12, %s1041_s12  }
   0x8   : > { %p52_p0 = scmp.ne.s32.totalorder %s752_s13, %s748_s12  ;;  %p831_p1 = scmp.eq.s32.totalorder %s483_s18, 0 }
   0x9   : > { %p835_p2 = scmp.eq.s32.totalorder %s483_s18, 1  ;;  %p136_p3 = scmp.eq.s32.totalorder %s484_s19, 1 }
   0xa   : > { %s1026_s20 = scalar_select %p831_p1, 1, 0 }
   0xb   : > { %s1027_s21 = scalar_select %p835_p2, 1, 0 }
   0xc   : > { %p841_p4 = por %p831_p1, %p52_p0  ;;  %p485_p5 = scmp.ge.s32.totalorder %s768_s17, 1 }
   0xd   : > { %p846_p6 = por %p136_p3, %p52_p0  ;;  %p143_p7 = scmp.lt.s32.totalorder %s768_s17, 3 }
   0xe   : > { %s1028_s22 = scalar_select %p841_p4, 1, 0 }
   0xf   : > { %s1029_s23 = scalar_select %p846_p6, 1, 0 }
  0x10   : > { %p851_p8 = pnand %p485_p5, %p143_p7  ;;  %s770_s25 = smov [#allocation5]  }
  0x11   : > { %s157_s26 = sshll.u32 %s770_s25, 4  ;;  %s32_s28 = sadd.s32 1, %s764_s16  ;;  %s158_s26 = int_to_ptr.vmem [resolvable:$true] %s157_s26 }
  0x12   : > { %s1030_s24 = scalar_select %p851_p8, 1, 0 }
  0x13   : > { %p545_p9 = pneg %p851_p8  ;;  %s624_s4 = scalar_lea.hbm %s1019_s1, 1024 }
  0x14   : > { %p625_p12 = scmp.ne.s32.totalorder %s1019_s1, %s624_s4  ;;  %p631_p5 = scmp.lt.u32.totalorder %s624_s4, %s1019_s1 }
  0x15   : > { %p860_p11 = pnand %p545_p9, %p831_p1 }
  0x17   : > { %p626_p13 = pneg %p860_p11 }
  0x19   : > { %p627_p0 = pnand %p626_p13, %p625_p12 }
  0x1b   : > { %p628_p3 = pneg %p627_p0 }
  0x1d   : > { %p633_p7 = pnand %p631_p5, %p628_p3 }
  0x1f   : > { %636 = shalt.err (!%p633_p7)
}
  0x20   : > { %s637_s9 = scalar_lea.vmem %s158_s26, 1024  ;;  %p645_p1 = scmp.lt.s32.totalorder %s158_s26, %s158_s26 }
  0x21   : > { %p638_p9 = scmp.ne.s32.totalorder %s158_s26, %s637_s9  ;;  %p646_p4 = scmp.lt.s32.totalorder %s637_s9, %s637_s9 }
  0x23   : > { %p640_p10 = pnand %p638_p9, %p626_p13  ;;  %p647_p8 = por %p646_p4, %p645_p1 }
  0x25   : > { %p641_p6 = pneg %p640_p10 }
  0x27   : > { %p648_p2 = pnand %p647_p8, %p641_p6 }
  0x29   : > { %651 = shalt.err (!%p648_p2)
}
  0x2a   : > { %s771_s10 = smov 64   ;;  %s772_s11 = smov 4  }
  0x2b   : > { %548 = dma.hbm_to_vmem [thread:$0]  (!%p860_p11), %s1019_s1, 1024, %s158_s26, [#allocation6], %s771_s10, %s771_s10, %s772_s11  }
  0x2c   : > { %p34_p1 = scmp.ge.s32.totalorder %s32_s28, 2  ;;  %s39_s25 = sadd.s32 1, %s756_s14 }
  0x2d   : > { %p46_p2 = scmp.ne.s32.totalorder %s756_s14, %s752_s13  ;;  %p47_p4 = scmp.eq.s32.totalorder %s768_s17, 0 }
  0x2e   : > { %s1047_s28 = smov (%p34_p1, %s32_s28), 0  ;;  %p1033_p8 = scmp.ne.s32.totalorder %s1027_s21, 0 }
  0x2f   : > { %p887_p6 = por %p47_p4, %p46_p2  ;;  %s36_s27 = ssub.s32 %s764_s16, %s1047_s28 }
  0x30   : > { %p893_p10 = por %p1033_p8, %p46_p2  ;;  %p558_p12 = scmp.lt.s32.totalorder %s768_s17, 2 }
  0x31   : > { %p37_p11 = scmp.eq.s32.totalorder %s36_s27, 0  ;;  %s177_s26 = sand.u32 1, %s756_s14  }
  0x32   : > { %s489_s4 = sshll.u32 %s177_s26, 3  ;;  %s490_s6 = sshll.u32 %s764_s16, 7 }
  0x33   : > { %s902_s5 = scalar_select %p37_p11, %s756_s14, %s39_s25  }
  0x34   : > { %s908_s9 = scalar_lea.hbm %s1018_s0, %s490_s6  ;;  %s181_s21 = scalar_lea.vmem [#allocation2], %s489_s4 }
  0x35   : > { %s188_s10 = sshll.u32 %s181_s21, 4  ;;  %p914_p13 = pnand %p558_p12, %p887_p6  ;;  %s910_s10 = int_to_ptr.vmem [resolvable:$true] %s188_s10 }
  0x36   : > { %s178_s18 = scalar_lea.sflag [#allocation3], %s177_s26  ;;  %s652_s19 = scalar_lea.hbm %s908_s9, 128 }
  0x37   : > { %p653_p0 = scmp.ne.s32.totalorder %s908_s9, %s652_s19  ;;  %p654_p3 = pneg %p914_p13 }
  0x38   : > { %s657_s4 = scalar_lea.hbm %s1018_s0, 256  ;;  %p658_p9 = scmp.lt.u32.totalorder %s908_s9, %s1018_s0 }
  0x39   : > { %p655_p5 = pnand %p654_p3, %p653_p0  ;;  %p659_p1 = scmp.lt.u32.totalorder %s657_s4, %s652_s19 }
  0x3a   : > { %p661_p4 = scmp.lt.u32.totalorder %s652_s19, %s908_s9 }
  0x3b   : > { %p656_p7 = pneg %p655_p5  ;;  %p660_p2 = por %p659_p1, %p658_p9 }
  0x3d   : > { %p662_p6 = por %p661_p4, %p660_p2 }
  0x3f   : > { %p663_p8 = pnand %p662_p6, %p656_p7 }
  0x41   : > { %666 = shalt.err (!%p663_p8)
}
  0x42   : > { %s667_s26 = scalar_lea.vmem %s910_s10, 128  ;;  %s773_s7 = smov [#allocation2]  }
  0x43   : > { %p668_p12 = scmp.ne.s32.totalorder %s910_s10, %s667_s26  ;;  %s672_s8 = sshll.u32 %s773_s7, 4  ;;  %s673_s8 = int_to_ptr.vmem [resolvable:$false] %s672_s8 }
  0x44   : > { %s674_s21 = scalar_lea.vmem %s673_s8, 256  ;;  %p675_p5 = scmp.lt.s32.totalorder %s910_s10, %s673_s8 }
  0x45   : > { %p670_p11 = pnand %p668_p12, %p654_p3  ;;  %p676_p9 = scmp.lt.s32.totalorder %s674_s21, %s667_s26 }
  0x47   : > { %p671_p0 = pneg %p670_p11  ;;  %p677_p1 = por %p676_p9, %p675_p5 }
  0x49   : > { %p678_p2 = pnand %p677_p1, %p671_p0 }
  0x4b   : > { %681 = shalt.err (!%p678_p2)
}
  0x4c   : > { %552 = dma.hbm_to_vmem [thread:$0]  (!%p914_p13), %s908_s9, 128, %s910_s10, %s178_s18  }
  0x4d   : > { %p1036_p7 = scmp.ne.s32.totalorder %s1030_s24, 0 }
  0x4e   : > { %s946_s19 = sand.u32 (!%p1036_p7), 1, %s752_s13   ;;  %p1037_p3 = scmp.ne.s32.totalorder (!%p1036_p7), %s1028_s22, 0 }
  0x4f   : > { %197 = sbr.rel (%p1036_p7) target bundleno = 488 (0x1e8), region = 32  ;;  %s492_s25 = sshll.u32 (!%p1036_p7), %s946_s19, 3 }
  0x50   : > { %s200_s27 = scalar_lea.sflag (!%p1036_p7), [#allocation3], %s946_s19  ;;  %s203_s4 = scalar_lea.vmem (!%p1036_p7), [#allocation2], %s492_s25 }
  0x56   : > { %735 = dma.done.wait (%p1037_p3), %s200_s27, 128  }
  0x57   : > { %737 = vsyncadd (%p1037_p3), %s200_s27, 4294967168  ;;  %p1038_p13 = scmp.ne.s32.totalorder %s1026_s20, 0 }
  0x59   : > { %739 = dma.done.wait (%p1038_p13), [#allocation6], 1024  }
  0x5a   : > { %741 = vsyncadd (%p1038_p13), [#allocation6], 4294966272  ;;  %v774_v0 = vmov 0.0   ;;  %v237_v1 = vld [vmem:[%s203_s4] sm:$0xff]  ;;  %v614_v3 = vld [vmem:[#allocation5] sm:$0xff]   ;;  %vm775_vm0 = vmmov 0  }
  0x5b   : > { %517 = vmatprep.subr.bf16.mxu0 %v774_v0  ;;  %238 = vadd.xlane.f32.xlu0 %v237_v1  ;;  %v241_v2 = vmul.f32 %v237_v1, %v237_v1  ;;  %v615_v4 = vld [vmem:[#allocation5 + $0x8] sm:$0xff]   ;;  %v616_v5 = vld [vmem:[#allocation5 + $0x10] sm:$0xff]   ;;  %v617_v6 = vld [vmem:[#allocation5 + $0x18] sm:$0xff]   ;;  %s505_s24 = sshll.u32 %s760_s15, 7  ;;  %s232_s9 = scalar_lea.vmem [#allocation7], %s492_s25 }
  0x5c   : > { %518 = vmatpush3.bf16.msra.mxu0 %v614_v3  ;;  %v618_v7 = vld [vmem:[#allocation5 + $0x20] sm:$0xff]   ;;  %v619_v8 = vld [vmem:[#allocation5 + $0x28] sm:$0xff]   ;;  %533 = vmatprep.mubr.msk.bf16.mxu0 %vm775_vm0, %v774_v0  ;;  %v620_v9 = vld [vmem:[#allocation5 + $0x30] sm:$0xff]   ;;  %s380_s10 = sshll.u32 %s232_s9, 4  ;;  %s969_s29 = scalar_lea.hbm %s1021_s3, %s505_s24  ;;  %s971_s10 = int_to_ptr.vmem [resolvable:$true] %s380_s10 }
  0x5d   : > { %519 = vmatprep.subr.bf16.mxu0 %v774_v0  ;;  %v621_v10 = vld [vmem:[#allocation5 + $0x38] sm:$0xff]   ;;  %v495_v23 = vld [vmem:[%s1020_s2] ss:$0 sm:$0xff]  ;;  %s366_s15 = scalar_lea.sflag [#allocation4], %s946_s19  ;;  %s682_s6 = scalar_lea.vmem %s971_s10, 128 }
  0x5e   : > { %p683_p4 = scmp.ne.s32.totalorder %s971_s10, %s682_s6  ;;  %s776_s26 = smov [#allocation7]  }
  0x5f   : > { %242 = vadd.xlane.f32.xlu0 %v241_v2  ;;  %s686_s7 = sshll.u32 %s776_s26, 4  ;;  %s687_s7 = int_to_ptr.vmem [resolvable:$false] %s686_s7 }
  0x60   : > { %520 = vmatpush3.bf16.msra.mxu0 %v615_v4  ;;  %p684_p6 = pnand %p683_p4, %p893_p10  ;;  %s688_s8 = scalar_lea.vmem %s687_s7, 256 }
  0x61   : > { %521 = vmatprep.subr.bf16.mxu0 %v774_v0  ;;  %p689_p12 = scmp.lt.s32.totalorder %s971_s10, %s687_s7  ;;  %p690_p11 = scmp.lt.s32.totalorder %s688_s8, %s682_s6 }
  0x62   : > { %p685_p8 = pneg %p684_p6 }
  0x63   : > { %p691_p0 = por %p690_p11, %p689_p12 }
  0x64   : > { %522 = vmatpush3.bf16.msra.mxu0 %v616_v5 }
  0x65   : > { %523 = vmatprep.subr.bf16.mxu0 %v774_v0  ;;  %p692_p5 = pnand %p691_p0, %p685_p8 }
  0x68   : > { %524 = vmatpush3.bf16.msra.mxu0 %v617_v6 }
  0x69   : > { %525 = vmatprep.subr.bf16.mxu0 %v774_v0 }
  0x6c   : > { %526 = vmatpush3.bf16.msra.mxu0 %v618_v7 }
  0x6d   : > { %527 = vmatprep.subr.bf16.mxu0 %v774_v0 }
  0x70   : > { %528 = vmatpush3.bf16.msra.mxu0 %v619_v8 }
  0x71   : > { %529 = vmatprep.subr.bf16.mxu0 %v774_v0 }
  0x74   : > { %530 = vmatpush3.bf16.msra.mxu0 %v620_v9 }
  0x75   : > { %531 = vmatprep.subr.bf16.mxu0 %v774_v0 }
  0x78   : > { %532 = vmatpush3.bf16.msra.mxu0 %v621_v10 }
  0xe8   : > { %v239_v11 = vpop.xlane.xlu0 %238 }
  0xe9   : > { %v240_v12 = vmul.f32 0.03125, %v239_v11 }
  0xeb   : > { %v245_v14 = vmul.f32 %v240_v12, %v240_v12  ;;  %v250_v19 = vsub.f32 %v237_v1, %v240_v12 }
  0xec   : > { %v243_v13 = vpop.xlane.xlu0 %242 }
  0xed   : > { %v244_v15 = vmul.f32 0.03125, %v243_v13 }
  0xef   : > { %v246_v16 = vsub.f32 %v244_v15, %v245_v14 }
  0xf1   : > { %v247_v17 = vmax.f32 %v246_v16, 0.0 }
  0xf3   : > { %v248_v18 = vadd.f32 1e-05, %v247_v17 }
  0xf5   : > { %622 = vrsqrt.f32 %v248_v18 }
  0xff   : > { %v623_v20 = vpop.eup %622 }
 0x100   : > { %v251_v21 = vmul.f32 %v623_v20, %v250_v19 }
 0x102   : > { %v252_v22 = vpack.c.bf16 %v251_v21, %v251_v21 }
 0x104   : > { %534 = vmatmul.mubr.bf16.vlgmr.msra.gmra.mrb[0].mxu0 %v252_v22 }
 0x1d7   : > { %v358_v24 = vpop.f32.mrb[0].mxu0 }
 0x1d8   : > { %v359_v25 = vadd.f32 %v495_v23, %v358_v24  ;;  %v535_v26 = vpop.f32.mrb[1].mxu0 }
 0x1d9   : > { %v361_v27 = vpop.f32.mrb[2].mxu0 }
 0x1da   : > { %364 = vst [vmem:[%s232_s9] sm:$0xff] %v359_v25  ;;  %v536_v28 = vpop.f32.mrb[3].mxu0 }
 0x1db   : > { %695 = shalt.err (!%p692_p5)
}
 0x1dc   : > { %s696_s21 = scalar_lea.hbm %s969_s29, 128  ;;  %s700_s27 = scalar_lea.hbm %s1021_s3, 256 }
 0x1dd   : > { %p697_p9 = scmp.ne.s32.totalorder %s969_s29, %s696_s21  ;;  %p701_p7 = scmp.lt.u32.totalorder %s969_s29, %s1021_s3 }
 0x1de   : > { %p702_p3 = scmp.lt.u32.totalorder %s700_s27, %s696_s21  ;;  %p704_p4 = scmp.lt.u32.totalorder %s696_s21, %s969_s29 }
 0x1df   : > { %p698_p1 = pnand %p697_p9, %p893_p10 }
 0x1e0   : > { %p703_p13 = por %p702_p3, %p701_p7 }
 0x1e1   : > { %p699_p2 = pneg %p698_p1 }
 0x1e2   : > { %p705_p6 = por %p704_p4, %p703_p13 }
 0x1e4   : > { %p706_p8 = pnand %p705_p6, %p699_p2 }
 0x1e6   : > { %709 = shalt.err (!%p706_p8)
}
 0x1e7   : > { %543 = dma.vmem_to_hbm [thread:$0]  (%p893_p10), %s971_s10, 128, %s969_s29, %s366_s15  }
 0x1e8 PF: > { %s392_s22 = sand.u32 1, %s748_s12   ;;  %p1039_p12 = scmp.ne.s32.totalorder %s1029_s23, 0 }
 0x1e9   : > { %p1040_p11 = scmp.ge.s32.totalorder %s768_s17, 2  ;;  %s393_s24 = scalar_lea.sflag [#allocation4], %s392_s22 }
 0x1eb   : > { %p554_p0 = pnand %p1040_p11, %p1039_p12 }
 0x1ed   : > { %743 = dma.done.wait (!%p554_p0), %s393_s24, 128  }
 0x1ee   : > { %745 = vsyncadd (!%p554_p0), %s393_s24, 4294967168  ;;  %s20_s17 = sadd.s32 1, %s768_s17   ;;  %s1041_s12 = smov %s752_s13 }
 0x1ef   : > { %p17_p5 = scmp.ge.s32.totalorder %s20_s17, 4   ;;  %s1042_s13 = smov %s756_s14 }
 0x1f0   : > { %s1043_s14 = smov %s902_s5  ;;  %s1044_s15 = smov %s764_s16 }
 0x1f1   : > { %s1045_s16 = smov %s1047_s28  ;;  %19 = sbr.rel (!%p17_p5) target bundleno = 7 (0x7), region = 85 }
 0x1f8   :  { %398 = vsyncpa [#allocation3], 1 }
 0x1f9   :  { %400 = vsyncpa [#allocation3 + $0x1], 1 }
 0x1fa   :  { %401 = vsyncpa [#allocation6], 1 }
 0x1fb   :  { %402 = vsyncpa [#allocation4], 1 }
 0x1fc   :  { %404 = vsyncpa [#allocation4 + $0x1], 1 }

// kernel: tpu_custom_call.1
= control target key start
LH: loop header
LB: loop body
LE: loop exit
PB: predicated region body
PF: predicated region fallthrough
CT: control target
= control target key end

     0   :  { %8 = vsyncpa [#allocation3], 0  ;;  %s1018_s0 = inlined_call_operand.hbm [shape: f32[16,128], index: 0, kind: input, shape index: {}]   ;;  %s1019_s1 = inlined_call_operand.hbm [shape: bf16[128,128], index: 1, kind: input, shape index: {}]   ;;  %s1020_s2 = inlined_call_operand.vmem [shape: f32[1,128], index: 2, kind: input, shape index: {}]   ;;  %s1021_s3 = inlined_call_operand.hbm [shape: f32[16,128], index: 3, kind: output, shape index: {}]  }
   0x1   :  { %10 = vsyncpa [#allocation3 + $0x1], 0 }
   0x2   :  { %11 = vsyncpa [#allocation6], 0 }
   0x3   :  { %12 = vsyncpa [#allocation4], 0 }
   0x4   :  { %14 = vsyncpa [#allocation4 + $0x1], 0  ;;  %s797_s12 = smov 0   ;;  %s799_s13 = smov 0  }
   0x5   :  { %s801_s14 = smov 0   ;;  %s803_s15 = smov 0  }
   0x6   :  { %s805_s16 = smov 0   ;;  %s807_s17 = smov 0  }
   0x7 LB: > { %s483_s18 = sadd.s32 4294967295, %s768_s17   ;;  %s484_s19 = sadd.s32 4294967294, %s768_s17   ;;  %s768_s17 = sphi %s807_s17, %s20_s17   ;;  %s764_s16 = sphi %s805_s16, %s1045_s16   ;;  %s760_s15 = sphi %s803_s15, %s1044_s15   ;;  %s756_s14 = sphi %s801_s14, %s1043_s14   ;;  %s752_s13 = sphi %s799_s13, %s1042_s13   ;;  %s748_s12 = sphi %s797_s12, %s1041_s12  }
   0x8   : > { %p52_p0 = scmp.ne.s32.totalorder %s752_s13, %s748_s12  ;;  %p831_p1 = scmp.eq.s32.totalorder %s483_s18, 0 }
   0x9   : > { %p835_p2 = scmp.eq.s32.totalorder %s483_s18, 1  ;;  %p136_p3 = scmp.eq.s32.totalorder %s484_s19, 1 }
   0xa   : > { %s1026_s20 = scalar_select %p831_p1, 1, 0 }
   0xb   : > { %s1027_s21 = scalar_select %p835_p2, 1, 0 }
   0xc   : > { %p841_p4 = por %p831_p1, %p52_p0  ;;  %p485_p5 = scmp.ge.s32.totalorder %s768_s17, 1 }
   0xd   : > { %p846_p6 = por %p136_p3, %p52_p0  ;;  %p143_p7 = scmp.lt.s32.totalorder %s768_s17, 3 }
   0xe   : > { %s1028_s22 = scalar_select %p841_p4, 1, 0 }
   0xf   : > { %s1029_s23 = scalar_select %p846_p6, 1, 0 }
  0x10   : > { %p851_p8 = pnand %p485_p5, %p143_p7  ;;  %s770_s25 = smov [#allocation5]  }
  0x11   : > { %s157_s26 = sshll.u32 %s770_s25, 4  ;;  %s32_s28 = sadd.s32 1, %s764_s16  ;;  %s158_s26 = int_to_ptr.vmem [resolvable:$true] %s157_s26 }
  0x12   : > { %s1030_s24 = scalar_select %p851_p8, 1, 0 }
  0x13   : > { %p545_p9 = pneg %p851_p8  ;;  %s624_s4 = scalar_lea.hbm %s1019_s1, 1024 }
  0x14   : > { %p625_p12 = scmp.ne.s32.totalorder %s1019_s1, %s624_s4  ;;  %p631_p5 = scmp.lt.u32.totalorder %s624_s4, %s1019_s1 }
  0x15   : > { %p860_p11 = pnand %p545_p9, %p831_p1 }
  0x17   : > { %p626_p13 = pneg %p860_p11 }
  0x19   : > { %p627_p0 = pnand %p626_p13, %p625_p12 }
  0x1b   : > { %p628_p3 = pneg %p627_p0 }
  0x1d   : > { %p633_p7 = pnand %p631_p5, %p628_p3 }
  0x1f   : > { %636 = shalt.err (!%p633_p7)
}
  0x20   : > { %s637_s9 = scalar_lea.vmem %s158_s26, 1024  ;;  %p645_p1 = scmp.lt.s32.totalorder %s158_s26, %s158_s26 }
  0x21   : > { %p638_p9 = scmp.ne.s32.totalorder %s158_s26, %s637_s9  ;;  %p646_p4 = scmp.lt.s32.totalorder %s637_s9, %s637_s9 }
  0x23   : > { %p640_p10 = pnand %p638_p9, %p626_p13  ;;  %p647_p8 = por %p646_p4, %p645_p1 }
  0x25   : > { %p641_p6 = pneg %p640_p10 }
  0x27   : > { %p648_p2 = pnand %p647_p8, %p641_p6 }
  0x29   : > { %651 = shalt.err (!%p648_p2)
}
  0x2a   : > { %s771_s10 = smov 64   ;;  %s772_s11 = smov 4  }
  0x2b   : > { %548 = dma.hbm_to_vmem [thread:$0]  (!%p860_p11), %s1019_s1, 1024, %s158_s26, [#allocation6], %s771_s10, %s771_s10, %s772_s11  }
  0x2c   : > { %p34_p1 = scmp.ge.s32.totalorder %s32_s28, 2  ;;  %s39_s25 = sadd.s32 1, %s756_s14 }
  0x2d   : > { %p46_p2 = scmp.ne.s32.totalorder %s756_s14, %s752_s13  ;;  %p47_p4 = scmp.eq.s32.totalorder %s768_s17, 0 }
  0x2e   : > { %s1047_s28 = smov (%p34_p1, %s32_s28), 0  ;;  %p1033_p8 = scmp.ne.s32.totalorder %s1027_s21, 0 }
  0x2f   : > { %p887_p6 = por %p47_p4, %p46_p2  ;;  %s36_s27 = ssub.s32 %s764_s16, %s1047_s28 }
  0x30   : > { %p893_p10 = por %p1033_p8, %p46_p2  ;;  %p558_p12 = scmp.lt.s32.totalorder %s768_s17, 2 }
  0x31   : > { %p37_p11 = scmp.eq.s32.totalorder %s36_s27, 0  ;;  %s177_s26 = sand.u32 1, %s756_s14  }
  0x32   : > { %s489_s4 = sshll.u32 %s177_s26, 3  ;;  %s490_s6 = sshll.u32 %s764_s16, 7 }
  0x33   : > { %s902_s5 = scalar_select %p37_p11, %s756_s14, %s39_s25  }
  0x34   : > { %s908_s9 = scalar_lea.hbm %s1018_s0, %s490_s6  ;;  %s181_s21 = scalar_lea.vmem [#allocation2], %s489_s4 }
  0x35   : > { %s188_s10 = sshll.u32 %s181_s21, 4  ;;  %p914_p13 = pnand %p558_p12, %p887_p6  ;;  %s910_s10 = int_to_ptr.vmem [resolvable:$true] %s188_s10 }
  0x36   : > { %s178_s18 = scalar_lea.sflag [#allocation3], %s177_s26  ;;  %s652_s19 = scalar_lea.hbm %s908_s9, 128 }
  0x37   : > { %p653_p0 = scmp.ne.s32.totalorder %s908_s9, %s652_s19  ;;  %p654_p3 = pneg %p914_p13 }
  0x38   : > { %s657_s4 = scalar_lea.hbm %s1018_s0, 256  ;;  %p658_p9 = scmp.lt.u32.totalorder %s908_s9, %s1018_s0 }
  0x39   : > { %p655_p5 = pnand %p654_p3, %p653_p0  ;;  %p659_p1 = scmp.lt.u32.totalorder %s657_s4, %s652_s19 }
  0x3a   : > { %p661_p4 = scmp.lt.u32.totalorder %s652_s19, %s908_s9 }
  0x3b   : > { %p656_p7 = pneg %p655_p5  ;;  %p660_p2 = por %p659_p1, %p658_p9 }
  0x3d   : > { %p662_p6 = por %p661_p4, %p660_p2 }
  0x3f   : > { %p663_p8 = pnand %p662_p6, %p656_p7 }
  0x41   : > { %666 = shalt.err (!%p663_p8)
}
  0x42   : > { %s667_s26 = scalar_lea.vmem %s910_s10, 128  ;;  %s773_s7 = smov [#allocation2]  }
  0x43   : > { %p668_p12 = scmp.ne.s32.totalorder %s910_s10, %s667_s26  ;;  %s672_s8 = sshll.u32 %s773_s7, 4  ;;  %s673_s8 = int_to_ptr.vmem [resolvable:$false] %s672_s8 }
  0x44   : > { %s674_s21 = scalar_lea.vmem %s673_s8, 256  ;;  %p675_p5 = scmp.lt.s32.totalorder %s910_s10, %s673_s8 }
  0x45   : > { %p670_p11 = pnand %p668_p12, %p654_p3  ;;  %p676_p9 = scmp.lt.s32.totalorder %s674_s21, %s667_s26 }
  0x47   : > { %p671_p0 = pneg %p670_p11  ;;  %p677_p1 = por %p676_p9, %p675_p5 }
  0x49   : > { %p678_p2 = pnand %p677_p1, %p671_p0 }
  0x4b   : > { %681 = shalt.err (!%p678_p2)
}
  0x4c   : > { %552 = dma.hbm_to_vmem [thread:$0]  (!%p914_p13), %s908_s9, 128, %s910_s10, %s178_s18  }
  0x4d   : > { %p1036_p7 = scmp.ne.s32.totalorder %s1030_s24, 0 }
  0x4e   : > { %s946_s19 = sand.u32 (!%p1036_p7), 1, %s752_s13   ;;  %p1037_p3 = scmp.ne.s32.totalorder (!%p1036_p7), %s1028_s22, 0 }
  0x4f   : > { %197 = sbr.rel (%p1036_p7) target bundleno = 488 (0x1e8), region = 32  ;;  %s492_s25 = sshll.u32 (!%p1036_p7), %s946_s19, 3 }
  0x50   : > { %s200_s27 = scalar_lea.sflag (!%p1036_p7), [#allocation3], %s946_s19  ;;  %s203_s4 = scalar_lea.vmem (!%p1036_p7), [#allocation2], %s492_s25 }
  0x56   : > { %735 = dma.done.wait (%p1037_p3), %s200_s27, 128  }
  0x57   : > { %737 = vsyncadd (%p1037_p3), %s200_s27, 4294967168  ;;  %p1038_p13 = scmp.ne.s32.totalorder %s1026_s20, 0 }
  0x59   : > { %739 = dma.done.wait (%p1038_p13), [#allocation6], 1024  }
  0x5a   : > { %741 = vsyncadd (%p1038_p13), [#allocation6], 4294966272  ;;  %v774_v0 = vmov 0.0   ;;  %v237_v1 = vld [vmem:[%s203_s4] sm:$0xff]  ;;  %v614_v3 = vld [vmem:[#allocation5] sm:$0xff]   ;;  %vm775_vm0 = vmmov 0  }
  0x5b   : > { %517 = vmatprep.subr.bf16.mxu0 %v774_v0  ;;  %238 = vadd.xlane.f32.xlu0 %v237_v1  ;;  %v241_v2 = vmul.f32 %v237_v1, %v237_v1  ;;  %v615_v4 = vld [vmem:[#allocation5 + $0x8] sm:$0xff]   ;;  %v616_v5 = vld [vmem:[#allocation5 + $0x10] sm:$0xff]   ;;  %v617_v6 = vld [vmem:[#allocation5 + $0x18] sm:$0xff]   ;;  %s505_s24 = sshll.u32 %s760_s15, 7  ;;  %s232_s9 = scalar_lea.vmem [#allocation7], %s492_s25 }
  0x5c   : > { %518 = vmatpush3.bf16.msra.mxu0 %v614_v3  ;;  %v618_v7 = vld [vmem:[#allocation5 + $0x20] sm:$0xff]   ;;  %v619_v8 = vld [vmem:[#allocation5 + $0x28] sm:$0xff]   ;;  %533 = vmatprep.mubr.msk.bf16.mxu0 %vm775_vm0, %v774_v0  ;;  %v620_v9 = vld [vmem:[#allocation5 + $0x30] sm:$0xff]   ;;  %s380_s10 = sshll.u32 %s232_s9, 4  ;;  %s969_s29 = scalar_lea.hbm %s1021_s3, %s505_s24  ;;  %s971_s10 = int_to_ptr.vmem [resolvable:$true] %s380_s10 }
  0x5d   : > { %519 = vmatprep.subr.bf16.mxu0 %v774_v0  ;;  %v621_v10 = vld [vmem:[#allocation5 + $0x38] sm:$0xff]   ;;  %v495_v23 = vld [vmem:[%s1020_s2] ss:$0 sm:$0xff]  ;;  %s366_s15 = scalar_lea.sflag [#allocation4], %s946_s19  ;;  %s682_s6 = scalar_lea.vmem %s971_s10, 128 }
  0x5e   : > { %p683_p4 = scmp.ne.s32.totalorder %s971_s10, %s682_s6  ;;  %s776_s26 = smov [#allocation7]  }
  0x5f   : > { %242 = vadd.xlane.f32.xlu0 %v241_v2  ;;  %s686_s7 = sshll.u32 %s776_s26, 4  ;;  %s687_s7 = int_to_ptr.vmem [resolvable:$false] %s686_s7 }
  0x60   : > { %520 = vmatpush3.bf16.msra.mxu0 %v615_v4  ;;  %p684_p6 = pnand %p683_p4, %p893_p10  ;;  %s688_s8 = scalar_lea.vmem %s687_s7, 256 }
  0x61   : > { %521 = vmatprep.subr.bf16.mxu0 %v774_v0  ;;  %p689_p12 = scmp.lt.s32.totalorder %s971_s10, %s687_s7  ;;  %p690_p11 = scmp.lt.s32.totalorder %s688_s8, %s682_s6 }
  0x62   : > { %p685_p8 = pneg %p684_p6 }
  0x63   : > { %p691_p0 = por %p690_p11, %p689_p12 }
  0x64   : > { %522 = vmatpush3.bf16.msra.mxu0 %v616_v5 }
  0x65   : > { %523 = vmatprep.subr.bf16.mxu0 %v774_v0  ;;  %p692_p5 = pnand %p691_p0, %p685_p8 }
  0x68   : > { %524 = vmatpush3.bf16.msra.mxu0 %v617_v6 }
  0x69   : > { %525 = vmatprep.subr.bf16.mxu0 %v774_v0 }
  0x6c   : > { %526 = vmatpush3.bf16.msra.mxu0 %v618_v7 }
  0x6d   : > { %527 = vmatprep.subr.bf16.mxu0 %v774_v0 }
  0x70   : > { %528 = vmatpush3.bf16.msra.mxu0 %v619_v8 }
  0x71   : > { %529 = vmatprep.subr.bf16.mxu0 %v774_v0 }
  0x74   : > { %530 = vmatpush3.bf16.msra.mxu0 %v620_v9 }
  0x75   : > { %531 = vmatprep.subr.bf16.mxu0 %v774_v0 }
  0x78   : > { %532 = vmatpush3.bf16.msra.mxu0 %v621_v10 }
  0xe8   : > { %v239_v11 = vpop.xlane.xlu0 %238 }
  0xe9   : > { %v240_v12 = vmul.f32 0.03125, %v239_v11 }
  0xeb   : > { %v245_v14 = vmul.f32 %v240_v12, %v240_v12  ;;  %v250_v19 = vsub.f32 %v237_v1, %v240_v12 }
  0xec   : > { %v243_v13 = vpop.xlane.xlu0 %242 }
  0xed   : > { %v244_v15 = vmul.f32 0.03125, %v243_v13 }
  0xef   : > { %v246_v16 = vsub.f32 %v244_v15, %v245_v14 }
  0xf1   : > { %v247_v17 = vmax.f32 %v246_v16, 0.0 }
  0xf3   : > { %v248_v18 = vadd.f32 1e-05, %v247_v17 }
  0xf5   : > { %622 = vrsqrt.f32 %v248_v18 }
  0xff   : > { %v623_v20 = vpop.eup %622 }
 0x100   : > { %v251_v21 = vmul.f32 %v623_v20, %v250_v19 }
 0x102   : > { %v252_v22 = vpack.c.bf16 %v251_v21, %v251_v21 }
 0x104   : > { %534 = vmatmul.mubr.bf16.vlgmr.msra.gmra.mrb[0].mxu0 %v252_v22 }
 0x1d7   : > { %v358_v24 = vpop.f32.mrb[0].mxu0 }
 0x1d8   : > { %v359_v25 = vadd.f32 %v495_v23, %v358_v24  ;;  %v535_v26 = vpop.f32.mrb[1].mxu0 }
 0x1d9   : > { %v361_v27 = vpop.f32.mrb[2].mxu0 }
 0x1da   : > { %364 = vst [vmem:[%s232_s9] sm:$0xff] %v359_v25  ;;  %v536_v28 = vpop.f32.mrb[3].mxu0 }
 0x1db   : > { %695 = shalt.err (!%p692_p5)
}
 0x1dc   : > { %s696_s21 = scalar_lea.hbm %s969_s29, 128  ;;  %s700_s27 = scalar_lea.hbm %s1021_s3, 256 }
 0x1dd   : > { %p697_p9 = scmp.ne.s32.totalorder %s969_s29, %s696_s21  ;;  %p701_p7 = scmp.lt.u32.totalorder %s969_s29, %s1021_s3 }
 0x1de   : > { %p702_p3 = scmp.lt.u32.totalorder %s700_s27, %s696_s21  ;;  %p704_p4 = scmp.lt.u32.totalorder %s696_s21, %s969_s29 }
 0x1df   : > { %p698_p1 = pnand %p697_p9, %p893_p10 }
 0x1e0   : > { %p703_p13 = por %p702_p3, %p701_p7 }
 0x1e1   : > { %p699_p2 = pneg %p698_p1 }
 0x1e2   : > { %p705_p6 = por %p704_p4, %p703_p13 }
 0x1e4   : > { %p706_p8 = pnand %p705_p6, %p699_p2 }
 0x1e6   : > { %709 = shalt.err (!%p706_p8)
}
 0x1e7   : > { %543 = dma.vmem_to_hbm [thread:$0]  (%p893_p10), %s971_s10, 128, %s969_s29, %s366_s15  }
 0x1e8 PF: > { %s392_s22 = sand.u32 1, %s748_s12   ;;  %p1039_p12 = scmp.ne.s32.totalorder %s1029_s23, 0 }
 0x1e9   : > { %p1040_p11 = scmp.ge.s32.totalorder %s768_s17, 2  ;;  %s393_s24 = scalar_lea.sflag [#allocation4], %s392_s22 }
 0x1eb   : > { %p554_p0 = pnand %p1040_p11, %p1039_p12 }
 0x1ed   : > { %743 = dma.done.wait (!%p554_p0), %s393_s24, 128  }
 0x1ee   : > { %745 = vsyncadd (!%p554_p0), %s393_s24, 4294967168  ;;  %s20_s17 = sadd.s32 1, %s768_s17   ;;  %s1041_s12 = smov %s752_s13 }
 0x1ef   : > { %p17_p5 = scmp.ge.s32.totalorder %s20_s17, 4   ;;  %s1042_s13 = smov %s756_s14 }
 0x1f0   : > { %s1043_s14 = smov %s902_s5  ;;  %s1044_s15 = smov %s764_s16 }
 0x1f1   : > { %s1045_s16 = smov %s1047_s28  ;;  %19 = sbr.rel (!%p17_p5) target bundleno = 7 (0x7), region = 85 }
 0x1f8   :  { %398 = vsyncpa [#allocation3], 1 }
 0x1f9   :  { %400 = vsyncpa [#allocation3 + $0x1], 1 }
 0x1fa   :  { %401 = vsyncpa [#allocation6], 1 }
 0x1fb   :  { %402 = vsyncpa [#allocation4], 1 }
 0x1fc   :  { %404 = vsyncpa [#allocation4 + $0x1], 1 }

</bundles_post_ra>
